<compile_context>
chip_gen: v7x
topology: tpu7x:2x2x1
jax: 0.10.0
libtpu: 0.0.40
codegen_flags: <defaults>
</compile_context>

<pallas_src>
import functools
import math

import numpy as np
import jax
import jax.numpy as jnp
from jax.experimental import pallas as pl
from jax.experimental.pallas import tpu as pltpu


# ----------------------------------------------------------------------------
# Host-side filter design (numpy).  Mirrors kaiser_sinc_filter1d:
# torch.kaiser_window(periodic=False) == np.kaiser; torch `sinc` == np.sinc.
# ----------------------------------------------------------------------------
def kaiser_sinc_filter1d(cutoff, half_width, kernel_size):
    even = kernel_size % 2 == 0
    half_size = kernel_size // 2
    delta_f = 4 * half_width
    A = 2.285 * (half_size - 1) * math.pi * delta_f + 7.95
    if A > 50.0:
        beta = 0.1102 * (A - 8.7)
    elif A >= 21.0:
        beta = 0.5842 * (A - 21.0) ** 0.4 + 0.07886 * (A - 21.0)
    else:
        beta = 0.0
    window = np.kaiser(kernel_size, beta)
    if even:
        time = np.arange(-half_size, half_size) + 0.5
    else:
        time = np.arange(kernel_size) - half_size
    if cutoff == 0:
        return np.zeros(kernel_size, np.float64)
    filt = 2.0 * cutoff * window * np.sinc(2.0 * cutoff * time)
    filt = filt / filt.sum()
    return filt                                   # (K,)


def _round_up(v, m):
    return (v + m - 1) // m * m


# ----------------------------------------------------------------------------
# Runtime probe: does pltpu.roll follow jnp.roll semantics on this backend?
# (cheap, run once; on mismatch/failure we use a correct slice-based fallback)
# ----------------------------------------------------------------------------
_ROLL_PROBE = {}


def _hw_roll_is_jnp_roll():
    if "ok" not in _ROLL_PROBE:
        ok = False
        try:
            def probe(x_ref, o_ref):
                o_ref[...] = pltpu.roll(x_ref[...], 3, 1)

            x_np = np.tile(np.arange(128, dtype=np.float32)[None, :], (8, 1))
            y = pl.pallas_call(
                probe, out_shape=jax.ShapeDtypeStruct((8, 128), jnp.float32)
            )(jnp.asarray(x_np))
            ok = bool(np.array_equal(np.asarray(jax.device_get(y)),
                                     np.roll(x_np, 3, axis=1)))
        except Exception:
            ok = False
        _ROLL_PROBE["ok"] = ok
    return _ROLL_PROBE["ok"]


# ----------------------------------------------------------------------------
# Pallas kernel body: fused polyphase low-pass + decimate for one output tile.
#   xc_ref: (r, Nt, Lt)  phase columns of the current output tile
#   xn_ref: (r, Nt, 128) phase columns right after the tile (halo), or None
#   o_ref : (Nt, Lt)     lane-dense output tile
# ----------------------------------------------------------------------------
def _poly_accumulate(xc_ref, xn_ref, o_ref, *, taps, lt, sw, use_hw_roll):
    nt = o_ref.shape[0]
    main_w = lt - sw                      # lanes handled by whole-tile rolls (may be 0)

    def shift_left(v, q):
        # Returns y with y[:, i] == v[:, i + q] for i < width - q (tail lanes don't-care).
        if q == 0:
            return v
        width = v.shape[-1]
        if use_hw_roll:
            return pltpu.roll(v, width - q, 1)      # XLU lane rotate, no VMEM copy
        return jnp.roll(v, -q, axis=1)              # fallback: slices + concat (correct)

    acc_main = jnp.zeros((nt, main_w), jnp.float32) if main_w > 0 else None
    acc_tail = jnp.zeros((nt, sw), jnp.float32)

    for p in range(len(taps)):                      # static: r phases
        xc = xc_ref[p].astype(jnp.float32)          # cast hoisted out of the tap loop
        tail_src = xc[:, main_w:]                   # (nt, sw)  lane-aligned suffix
        if xn_ref is not None:
            tail_src = jnp.concatenate(
                [tail_src, xn_ref[p].astype(jnp.float32)], axis=1)   # (nt, sw+128)
        for q, t in enumerate(taps[p]):             # static: ceil(K/r) taps per phase
            if t == 0.0:
                continue
            if main_w > 0:
                acc_main = acc_main + t * shift_left(xc, q)[:, :main_w]
            acc_tail = acc_tail + t * shift_left(tail_src, q)[:, :sw]

    if main_w > 0:
        o_ref[:, :main_w] = acc_main.astype(o_ref.dtype)
        o_ref[:, main_w:] = acc_tail.astype(o_ref.dtype)
    else:
        o_ref[...] = acc_tail.astype(o_ref.dtype)


def _kernel_with_halo(xc_ref, xn_ref, o_ref, *, taps, lt, sw, use_hw_roll):
    _poly_accumulate(xc_ref, xn_ref, o_ref, taps=taps, lt=lt, sw=sw,
                     use_hw_roll=use_hw_roll)


def _kernel_no_halo(xc_ref, o_ref, *, taps, lt, sw, use_hw_roll):
    _poly_accumulate(xc_ref, None, o_ref, taps=taps, lt=lt, sw=sw,
                     use_hw_roll=use_hw_roll)


# ----------------------------------------------------------------------------
# Forward wrapper
# ----------------------------------------------------------------------------
def downsample1d(x, *, ratio=2, kernel_size=None, block_l=1024, block_n=256):
    """DownSample1d forward.  x:(B, C, L) -> (B, C, Lout)."""
    B, C, L = x.shape
    r = int(ratio)
    K = int(6 * r // 2) * 2 if kernel_size is None else int(kernel_size)
    filt = kaiser_sinc_filter1d(0.5 / r, 0.6 / r, K)

    even = K % 2 == 0
    pad_l = K // 2 - int(even)
    pad_r = K // 2
    Lp = L + pad_l + pad_r
    Lout = (Lp - K) // r + 1

    # Polyphase tap table: taps[p][q] = filt[q*r + p]  (zero-padded past K).
    Kq = -(-K // r)
    halo = Kq - 1
    if halo > 128:
        # TODO(synk): widen the halo block for kernel_size > ~128*ratio (never hit by defaults).
        raise NotImplementedError("kernel_size too large relative to ratio")
    tap_tbl = np.zeros((r, Kq), np.float64)
    for k in range(K):
        tap_tbl[k % r, k // r] = filt[k]
    taps = tuple(tuple(float(v) for v in row) for row in tap_tbl)

    # ---- tiling -------------------------------------------------------------
    HW = SW = 128                                  # halo-block / tail-strip width (lanes)
    block_l = max(128, _round_up(block_l, 128))
    if Lout >= 128:
        Lt = min(block_l, (Lout // 128) * 128)     # lane-dense, never exceeds the array dim
        Lout_alloc = Lout                          # exact output -> no full-output slice copy
    else:
        Lt = 128                                   # tiny problem: pad columns, slice afterwards
        Lout_alloc = 128
    nT = pl.cdiv(Lout_alloc, Lt)

    N = B * C
    block_n = max(8, _round_up(block_n, 8))
    Nt = N if N <= block_n else block_n            # sublane-dense; partial last block masked
    nN = pl.cdiv(N, Nt)

    # ---- glue: one merged replicate pad + phase de-interleave (single extra pass) --
    # TODO(synk): manual-DMA variant (x_padded kept in HBM, r strided copies per tile)
    # would avoid materializing `phases` if this pass shows up in profiles.
    Lph = nT * Lt + (HW if halo > 0 else 0)        # all kernel blocks stay fully in-bounds
    xf = x.reshape(N, L)
    xp = jnp.pad(xf, ((0, 0), (pad_l, r * Lph - L - pad_l)), mode="edge")
    phases = xp.reshape(N, Lph, r).transpose(2, 0, 1)          # (r, N, Lph)

    use_hw_roll = _hw_roll_is_jnp_roll()
    common = dict(taps=taps, lt=Lt, sw=SW, use_hw_roll=use_hw_roll)

    in_specs = [pl.BlockSpec((r, Nt, Lt), lambda n, j: (0, n, j))]
    operands = [phases]
    if halo > 0:
        lt_blocks = Lt // HW
        in_specs.append(
            pl.BlockSpec((r, Nt, HW), lambda n, j: (0, n, (j + 1) * lt_blocks)))
        operands.append(phases)
        kern = functools.partial(_kernel_with_halo, **common)
    else:
        kern = functools.partial(_kernel_no_halo, **common)

    itemsize = np.dtype(x.dtype).itemsize
    est = 2 * (r * Nt * Lt + (r * Nt * HW if halo > 0 else 0) + Nt * Lt) * itemsize
    vmem_limit = int(min(max(3 * est + (4 << 20), 32 << 20), 48 << 20))

    out = pl.pallas_call(
        kern,
        out_shape=jax.ShapeDtypeStruct((N, Lout_alloc), x.dtype),
        grid=(nN, nT),
        in_specs=in_specs,
        out_specs=pl.BlockSpec((Nt, Lt), lambda n, j: (n, j)),
        compiler_params=pltpu.CompilerParams(
            dimension_semantics=("parallel", "parallel"),
            vmem_limit_bytes=vmem_limit),
    )(*operands)

    if Lout_alloc != Lout:
        out = out[:, :Lout]
    return out.reshape(B, C, Lout)


# ----------------------------------------------------------------------------
# Pure-JAX reference (identical math, no Pallas) for self-check
# ----------------------------------------------------------------------------
def downsample1d_reference(x, *, ratio=2, kernel_size=None):
    B, C, L = x.shape
    r = int(ratio)
    K = int(6 * r // 2) * 2 if kernel_size is None else int(kernel_size)
    filt = kaiser_sinc_filter1d(0.5 / r, 0.6 / r, K)
    even = K % 2 == 0
    pad_l = K // 2 - int(even)
    pad_r = K // 2
    xp = jnp.pad(x, ((0, 0), (0, 0), (pad_l, pad_r)), mode="edge")
    Lp = xp.shape[-1]
    Lout = (Lp - K) // r + 1
    acc = jnp.zeros((B, C, Lout), jnp.float32)
    for k in range(K):
        sl = xp[:, :, k:k + r * (Lout - 1) + 1:r].astype(jnp.float32)
        acc = acc + float(filt[k]) * sl
    return acc.astype(x.dtype)


if __name__ == "__main__":
    k0, k1, k2 = jax.random.split(jax.random.PRNGKey(0), 3)

    # 1) Small module-consistent shape: (B, C, L) = (2, 4, 256), ratio=2 -> (2, 4, 128)
    x1 = jax.random.normal(k0, (2, 4, 256), jnp.float32)
    o1 = jax.block_until_ready(downsample1d(x1, ratio=2))
    r1 = downsample1d_reference(x1, ratio=2)
    assert o1.shape == (2, 4, 128), o1.shape
    assert bool(jnp.all(jnp.isfinite(o1)))
    assert bool(jnp.allclose(o1, r1, atol=1e-4, rtol=1e-4)), "mismatch vs reference (case 1)"

    # 2) Exercises multi-tile rows/length, cross-tile halo, masked partial blocks.
    x2 = jax.random.normal(k1, (2, 10, 2304), jnp.float32)
    o2 = jax.block_until_ready(downsample1d(x2, ratio=2, block_l=1024, block_n=16))
    r2 = downsample1d_reference(x2, ratio=2)
    assert o2.shape == (2, 10, 1152), o2.shape
    assert bool(jnp.allclose(o2, r2, atol=1e-4, rtol=1e-4)), "mismatch vs reference (case 2)"

    # 3) ratio=3 and Lout < 128 path.
    x3 = jax.random.normal(k2, (1, 6, 270), jnp.float32)
    o3 = jax.block_until_ready(downsample1d(x3, ratio=3))
    r3 = downsample1d_reference(x3, ratio=3)
    assert o3.shape == (1, 6, 90), o3.shape
    assert bool(jnp.allclose(o3, r3, atol=1e-4, rtol=1e-4)), "mismatch vs reference (case 3)"

    print("KERNEL_OK")
</pallas_src>

<mosaic_0001>
module attributes {stable_mosaic.version = 11 : i64} {
  func.func @probe(%arg0: memref<8x128xf32, #tpu.memory_space<vmem>>, %arg1: memref<8x128xf32, #tpu.memory_space<vmem>>) attributes {dimension_semantics = [], scalar_prefetch = 0 : i64, scratch_operands = 0 : i64, tpu.core_type = #tpu.core_type<tc>} {
    %c0 = arith.constant 0 : index
    %c0_0 = arith.constant 0 : index
    %0 = vector.load %arg0[%c0, %c0_0] : memref<8x128xf32, #tpu.memory_space<vmem>>, vector<8x128xf32>
    %c3_i32 = arith.constant 3 : i32
    %1 = tpu.dynamic_rotate %0 by %c3_i32 dim 1 : vector<8x128xf32>, i32 -> vector<8x128xf32>
    %c0_1 = arith.constant 0 : index
    %c0_2 = arith.constant 0 : index
    %2 = vector.load %arg1[%c0_1, %c0_2] : memref<8x128xf32, #tpu.memory_space<vmem>>, vector<8x128xf32>
    tpu.vector_store %arg1[%c0_1, %c0_2], %1 {strides = array<i32>} : memref<8x128xf32, #tpu.memory_space<vmem>>, vector<8x128xf32>,
    return
  }
}

module attributes {stable_mosaic.version = 11 : i64} {
  func.func @_kernel_with_halo(%arg0: i32, %arg1: i32, %arg2: memref<2x8x128xf32, #tpu.memory_space<vmem>>, %arg3: memref<2x8x128xf32, #tpu.memory_space<vmem>>, %arg4: memref<8x128xf32, #tpu.memory_space<vmem>>) attributes {dimension_semantics = [#tpu.dimension_semantics<parallel>, #tpu.dimension_semantics<parallel>], iteration_bounds = array<i64: 1, 1>, scalar_prefetch = 0 : i64, scratch_operands = 0 : i64, tpu.core_type = #tpu.core_type<tc>, window_params = [{transform_indices = @transform_0, window_bounds = array<i64: 2, 8, 128>}, {transform_indices = @transform_1, window_bounds = array<i64: 2, 8, 128>}, {transform_indices = @transform_2, window_bounds = array<i64: 8, 128>}]} {
    %cst = arith.constant 0.000000e+00 : f32
    %0 = vector.broadcast %cst : f32 to vector<8x128xf32>
    %c0 = arith.constant 0 : index
    %c0_0 = arith.constant 0 : index
    %c0_1 = arith.constant 0 : index
    %1 = vector.load %arg2[%c0, %c0_0, %c0_1] : memref<2x8x128xf32, #tpu.memory_space<vmem>>, vector<1x8x128xf32>
    %2 = vector.shape_cast %1 : vector<1x8x128xf32> to vector<8x128xf32>
    %c0_2 = arith.constant 0 : index
    %c0_3 = arith.constant 0 : index
    %c0_4 = arith.constant 0 : index
    %3 = vector.load %arg3[%c0_2, %c0_3, %c0_4] : memref<2x8x128xf32, #tpu.memory_space<vmem>>, vector<1x8x128xf32>
    %4 = vector.shape_cast %3 : vector<1x8x128xf32> to vector<8x128xf32>
    %5 = tpu.concatenate %2, %4 in 1 : vector<8x128xf32>, vector<8x128xf32> -> vector<8x256xf32>
    %6 = vector.extract_strided_slice %5 {offsets = [0, 0], sizes = [8, 128], strides = [1, 1]} : vector<8x256xf32> to vector<8x128xf32>
    %cst_5 = arith.constant 0.00202896656 : f32
    %7 = vector.broadcast %cst_5 : f32 to vector<8x128xf32>
    %8 = arith.mulf %7, %6 : vector<8x128xf32>
    %9 = arith.addf %0, %8 : vector<8x128xf32>
    %10 = vector.extract_strided_slice %5 {offsets = [0, 1], sizes = [8, 255], strides = [1, 1]} : vector<8x256xf32> to vector<8x255xf32>
    %11 = vector.extract_strided_slice %5 {offsets = [0, 0], sizes = [8, 1], strides = [1, 1]} : vector<8x256xf32> to vector<8x1xf32>
    %12 = tpu.concatenate %10, %11 in 1 : vector<8x255xf32>, vector<8x1xf32> -> vector<8x256xf32>
    %13 = vector.extract_strided_slice %12 {offsets = [0, 0], sizes = [8, 128], strides = [1, 1]} : vector<8x256xf32> to vector<8x128xf32>
    %cst_6 = arith.constant -0.0255434643 : f32
    %14 = vector.broadcast %cst_6 : f32 to vector<8x128xf32>
    %15 = arith.mulf %14, %13 : vector<8x128xf32>
    %16 = arith.addf %9, %15 : vector<8x128xf32>
    %17 = vector.extract_strided_slice %5 {offsets = [0, 2], sizes = [8, 254], strides = [1, 1]} : vector<8x256xf32> to vector<8x254xf32>
    %18 = vector.extract_strided_slice %5 {offsets = [0, 0], sizes = [8, 2], strides = [1, 1]} : vector<8x256xf32> to vector<8x2xf32>
    %19 = tpu.concatenate %17, %18 in 1 : vector<8x254xf32>, vector<8x2xf32> -> vector<8x256xf32>
    %20 = vector.extract_strided_slice %19 {offsets = [0, 0], sizes = [8, 128], strides = [1, 1]} : vector<8x256xf32> to vector<8x128xf32>
    %cst_7 = arith.constant 0.128572613 : f32
    %21 = vector.broadcast %cst_7 : f32 to vector<8x128xf32>
    %22 = arith.mulf %21, %20 : vector<8x128xf32>
    %23 = arith.addf %16, %22 : vector<8x128xf32>
    %24 = vector.extract_strided_slice %5 {offsets = [0, 3], sizes = [8, 253], strides = [1, 1]} : vector<8x256xf32> to vector<8x253xf32>
    %25 = vector.extract_strided_slice %5 {offsets = [0, 0], sizes = [8, 3], strides = [1, 1]} : vector<8x256xf32> to vector<8x3xf32>
    %26 = tpu.concatenate %24, %25 in 1 : vector<8x253xf32>, vector<8x3xf32> -> vector<8x256xf32>
    %27 = vector.extract_strided_slice %26 {offsets = [0, 0], sizes = [8, 128], strides = [1, 1]} : vector<8x256xf32> to vector<8x128xf32>
    %cst_8 = arith.constant 0.443209797 : f32
    %28 = vector.broadcast %cst_8 : f32 to vector<8x128xf32>
    %29 = arith.mulf %28, %27 : vector<8x128xf32>
    %30 = arith.addf %23, %29 : vector<8x128xf32>
    %31 = vector.extract_strided_slice %5 {offsets = [0, 4], sizes = [8, 252], strides = [1, 1]} : vector<8x256xf32> to vector<8x252xf32>
    %32 = vector.extract_strided_slice %5 {offsets = [0, 0], sizes = [8, 4], strides = [1, 1]} : vector<8x256xf32> to vector<8x4xf32>
    %33 = tpu.concatenate %31, %32 in 1 : vector<8x252xf32>, vector<8x4xf32> -> vector<8x256xf32>
    %34 = vector.extract_strided_slice %33 {offsets = [0, 0], sizes = [8, 128], strides = [1, 1]} : vector<8x256xf32> to vector<8x128xf32>
    %cst_9 = arith.constant -0.0576573759 : f32
    %35 = vector.broadcast %cst_9 : f32 to vector<8x128xf32>
    %36 = arith.mulf %35, %34 : vector<8x128xf32>
    %37 = arith.addf %30, %36 : vector<8x128xf32>
    %38 = vector.extract_strided_slice %5 {offsets = [0, 5], sizes = [8, 251], strides = [1, 1]} : vector<8x256xf32> to vector<8x251xf32>
    %39 = vector.extract_strided_slice %5 {offsets = [0, 0], sizes = [8, 5], strides = [1, 1]} : vector<8x256xf32> to vector<8x5xf32>
    %40 = tpu.concatenate %38, %39 in 1 : vector<8x251xf32>, vector<8x5xf32> -> vector<8x256xf32>
    %41 = vector.extract_strided_slice %40 {offsets = [0, 0], sizes = [8, 128], strides = [1, 1]} : vector<8x256xf32> to vector<8x128xf32>
    %cst_10 = arith.constant 0.00938946381 : f32
    %42 = vector.broadcast %cst_10 : f32 to vector<8x128xf32>
    %43 = arith.mulf %42, %41 : vector<8x128xf32>
    %44 = arith.addf %37, %43 : vector<8x128xf32>
    %c1 = arith.constant 1 : index
    %c0_11 = arith.constant 0 : index
    %c0_12 = arith.constant 0 : index
    %45 = vector.load %arg2[%c1, %c0_11, %c0_12] : memref<2x8x128xf32, #tpu.memory_space<vmem>>, vector<1x8x128xf32>
    %46 = vector.shape_cast %45 : vector<1x8x128xf32> to vector<8x128xf32>
    %c1_13 = arith.constant 1 : index
    %c0_14 = arith.constant 0 : index
    %c0_15 = arith.constant 0 : index
    %47 = vector.load %arg3[%c1_13, %c0_14, %c0_15] : memref<2x8x128xf32, #tpu.memory_space<vmem>>, vector<1x8x128xf32>
    %48 = vector.shape_cast %47 : vector<1x8x128xf32> to vector<8x128xf32>
    %49 = tpu.concatenate %46, %48 in 1 : vector<8x128xf32>, vector<8x128xf32> -> vector<8x256xf32>
    %50 = vector.extract_strided_slice %49 {offsets = [0, 0], sizes = [8, 128], strides = [1, 1]} : vector<8x256xf32> to vector<8x128xf32>
    %cst_16 = arith.constant 0.00938946381 : f32
    %51 = vector.broadcast %cst_16 : f32 to vector<8x128xf32>
    %52 = arith.mulf %51, %50 : vector<8x128xf32>
    %53 = arith.addf %44, %52 : vector<8x128xf32>
    %54 = vector.extract_strided_slice %49 {offsets = [0, 1], sizes = [8, 255], strides = [1, 1]} : vector<8x256xf32> to vector<8x255xf32>
    %55 = vector.extract_strided_slice %49 {offsets = [0, 0], sizes = [8, 1], strides = [1, 1]} : vector<8x256xf32> to vector<8x1xf32>
    %56 = tpu.concatenate %54, %55 in 1 : vector<8x255xf32>, vector<8x1xf32> -> vector<8x256xf32>
    %57 = vector.extract_strided_slice %56 {offsets = [0, 0], sizes = [8, 128], strides = [1, 1]} : vector<8x256xf32> to vector<8x128xf32>
    %cst_17 = arith.constant -0.0576573759 : f32
    %58 = vector.broadcast %cst_17 : f32 to vector<8x128xf32>
    %59 = arith.mulf %58, %57 : vector<8x128xf32>
    %60 = arith.addf %53, %59 : vector<8x128xf32>
    %61 = vector.extract_strided_slice %49 {offsets = [0, 2], sizes = [8, 254], strides = [1, 1]} : vector<8x256xf32> to vector<8x254xf32>
    %62 = vector.extract_strided_slice %49 {offsets = [0, 0], sizes = [8, 2], strides = [1, 1]} : vector<8x256xf32> to vector<8x2xf32>
    %63 = tpu.concatenate %61, %62 in 1 : vector<8x254xf32>, vector<8x2xf32> -> vector<8x256xf32>
    %64 = vector.extract_strided_slice %63 {offsets = [0, 0], sizes = [8, 128], strides = [1, 1]} : vector<8x256xf32> to vector<8x128xf32>
    %cst_18 = arith.constant 0.443209797 : f32
    %65 = vector.broadcast %cst_18 : f32 to vector<8x128xf32>
    %66 = arith.mulf %65, %64 : vector<8x128xf32>
    %67 = arith.addf %60, %66 : vector<8x128xf32>
    %68 = vector.extract_strided_slice %49 {offsets = [0, 3], sizes = [8, 253], strides = [1, 1]} : vector<8x256xf32> to vector<8x253xf32>
    %69 = vector.extract_strided_slice %49 {offsets = [0, 0], sizes = [8, 3], strides = [1, 1]} : vector<8x256xf32> to vector<8x3xf32>
    %70 = tpu.concatenate %68, %69 in 1 : vector<8x253xf32>, vector<8x3xf32> -> vector<8x256xf32>
    %71 = vector.extract_strided_slice %70 {offsets = [0, 0], sizes = [8, 128], strides = [1, 1]} : vector<8x256xf32> to vector<8x128xf32>
    %cst_19 = arith.constant 0.128572613 : f32
    %72 = vector.broadcast %cst_19 : f32 to vector<8x128xf32>
    %73 = arith.mulf %72, %71 : vector<8x128xf32>
    %74 = arith.addf %67, %73 : vector<8x128xf32>
    %75 = vector.extract_strided_slice %49 {offsets = [0, 4], sizes = [8, 252], strides = [1, 1]} : vector<8x256xf32> to vector<8x252xf32>
    %76 = vector.extract_strided_slice %49 {offsets = [0, 0], sizes = [8, 4], strides = [1, 1]} : vector<8x256xf32> to vector<8x4xf32>
    %77 = tpu.concatenate %75, %76 in 1 : vector<8x252xf32>, vector<8x4xf32> -> vector<8x256xf32>
    %78 = vector.extract_strided_slice %77 {offsets = [0, 0], sizes = [8, 128], strides = [1, 1]} : vector<8x256xf32> to vector<8x128xf32>
    %cst_20 = arith.constant -0.0255434643 : f32
    %79 = vector.broadcast %cst_20 : f32 to vector<8x128xf32>
    %80 = arith.mulf %79, %78 : vector<8x128xf32>
    %81 = arith.addf %74, %80 : vector<8x128xf32>
    %82 = vector.extract_strided_slice %49 {offsets = [0, 5], sizes = [8, 251], strides = [1, 1]} : vector<8x256xf32> to vector<8x251xf32>
    %83 = vector.extract_strided_slice %49 {offsets = [0, 0], sizes = [8, 5], strides = [1, 1]} : vector<8x256xf32> to vector<8x5xf32>
    %84 = tpu.concatenate %82, %83 in 1 : vector<8x251xf32>, vector<8x5xf32> -> vector<8x256xf32>
    %85 = vector.extract_strided_slice %84 {offsets = [0, 0], sizes = [8, 128], strides = [1, 1]} : vector<8x256xf32> to vector<8x128xf32>
    %cst_21 = arith.constant 0.00202896656 : f32
    %86 = vector.broadcast %cst_21 : f32 to vector<8x128xf32>
    %87 = arith.mulf %86, %85 : vector<8x128xf32>
    %88 = arith.addf %81, %87 : vector<8x128xf32>
    %c0_22 = arith.constant 0 : index
    %c0_23 = arith.constant 0 : index
    %89 = vector.load %arg4[%c0_22, %c0_23] : memref<8x128xf32, #tpu.memory_space<vmem>>, vector<8x128xf32>
    tpu.vector_store %arg4[%c0_22, %c0_23], %88 {strides = array<i32>} : memref<8x128xf32, #tpu.memory_space<vmem>>, vector<8x128xf32>,
    return
  }
  func.func @transform_0(%arg0: i32, %arg1: i32) -> (i32, i32, i32) {
    %c0_i32 = arith.constant 0 : i32
    %c0_i32_0 = arith.constant 0 : i32
    return %c0_i32, %arg0, %arg1 : i32, i32, i32
  }
  func.func @transform_1(%arg0: i32, %arg1: i32) -> (i32, i32, i32) {
    %c1_i32 = arith.constant 1 : i32
    %0 = arith.addi %arg1, %c1_i32 : i32
    %c1_i32_0 = arith.constant 1 : i32
    %1 = arith.muli %0, %c1_i32_0 : i32
    %c0_i32 = arith.constant 0 : i32
    %c0_i32_1 = arith.constant 0 : i32
    return %c0_i32, %arg0, %1 : i32, i32, i32
  }
  func.func @transform_2(%arg0: i32, %arg1: i32) -> (i32, i32) {
    %c0_i32 = arith.constant 0 : i32
    return %arg0, %arg1 : i32, i32
  }
}

</mosaic_0001>

<bundles_post_ra>
// kernel: tpu_custom_call.1
= control target key start
LH: loop header
LB: loop body
LE: loop exit
PB: predicated region body
PF: predicated region fallthrough
CT: control target
= control target key end

     0   :  { %6 = vsyncpa [#allocation3], 0  ;;  %s128_s0 = inlined_call_operand.hbm [shape: f32[8,128], index: 0, kind: input, shape index: {}]   ;;  %s129_s1 = inlined_call_operand.hbm [shape: f32[8,128], index: 1, kind: output, shape index: {}]  }
   0x1   :  { %7 = vsyncpa [#allocation4], 0  ;;  %s91_s6 = smov [#allocation2]   ;;  %s43_s10 = scalar_lea.hbm %s128_s0, 128 }
   0x2   :  { %s14_s7 = sshll.u32 %s91_s6, 4  ;;  %p44_p0 = scmp.ne.s32.totalorder %s128_s0, %s43_s10  ;;  %s15_s7 = int_to_ptr.vmem [resolvable:$true] %s14_s7 }
   0x3   :  { %p47_p1 = scmp.lt.u32.totalorder %s43_s10, %s128_s0 }
   0x5   :  { %p49_p2 = pnand %p47_p1, %p44_p0 }
   0x7   :  { %52 = shalt.err (!%p49_p2)
}
   0x8   :  { %s53_s15 = scalar_lea.vmem %s15_s7, 128  ;;  %p58_p4 = scmp.lt.s32.totalorder %s15_s7, %s15_s7 }
   0x9   :  { %p54_p3 = scmp.ne.s32.totalorder %s15_s7, %s53_s15  ;;  %p59_p5 = scmp.lt.s32.totalorder %s53_s15, %s53_s15 }
   0xb   :  { %p60_p6 = por %p59_p5, %p58_p4 }
   0xd   :  { %p61_p7 = pnand %p60_p6, %p54_p3 }
   0xf   :  { %64 = shalt.err (!%p61_p7)
}
  0x10   :  { %17 = dma.hbm_to_vmem [thread:$0]  %s128_s0, 128, %s15_s7, [#allocation3]  }
  0x11   :  { %87 = dma.done.wait [#allocation3], 128  }
  0x12   :  { %88 = vsyncadd [#allocation3], 4294967168  ;;  %v21_v0 = vld [vmem:[#allocation2] sm:$0xff]  ;;  %s92_s18 = smov 3   ;;  %s93_s19 = smov [#allocation5]  }
  0x13   :  { %22 = vrot.lane.b32.xlu0 %v21_v0, %s92_s18  ;;  %s31_s20 = sshll.u32 %s93_s19, 4  ;;  %s32_s20 = int_to_ptr.vmem [resolvable:$true] %s31_s20 }
  0x14   :  { %s65_s21 = scalar_lea.vmem %s32_s20, 128  ;;  %p70_p9 = scmp.lt.s32.totalorder %s32_s20, %s32_s20 }
  0x15   :  { %p66_p8 = scmp.ne.s32.totalorder %s32_s20, %s65_s21  ;;  %p71_p10 = scmp.lt.s32.totalorder %s65_s21, %s65_s21 }
  0x17   :  { %p72_p11 = por %p71_p10, %p70_p9 }
  0x19   :  { %p73_p12 = pnand %p72_p11, %p66_p8 }
  0x85   :  { %v23_v1 = vpop.permute.xlu0 %22 }
  0x86   :  { %24 = vst [vmem:[#allocation5] sm:$0xff] %v23_v1 }
  0x87   :  { %76 = shalt.err (!%p73_p12)
}
  0x88   :  { %s77_s0 = scalar_lea.hbm %s129_s1, 128 }
  0x89   :  { %p78_p13 = scmp.ne.s32.totalorder %s129_s1, %s77_s0  ;;  %p81_p0 = scmp.lt.u32.totalorder %s77_s0, %s129_s1 }
  0x8b   :  { %p83_p1 = pnand %p81_p0, %p78_p13 }
  0x8d   :  { %86 = shalt.err (!%p83_p1)
}
  0x8e   :  { %34 = dma.vmem_to_hbm [thread:$0]  %s32_s20, 128, %s129_s1, [#allocation4]  }
  0x8f   :  { %89 = dma.done.wait [#allocation4], 128  }
  0x90   :  { %90 = vsyncadd [#allocation4], 4294967168 }
  0x91   :  { %38 = vsyncpa [#allocation3], 1 }
  0x92   :  { %39 = vsyncpa [#allocation4], 1 }

// kernel: tpu_custom_call.1
= control target key start
LH: loop header
LB: loop body
LE: loop exit
PB: predicated region body
PF: predicated region fallthrough
CT: control target
= control target key end

     0   :  { %7 = vsyncpa [#allocation3], 0  ;;  %s322_s0 = inlined_call_operand.hbm [shape: f32[2,8,256], index: 0, kind: input, shape index: {}]   ;;  %s323_s1 = inlined_call_operand.hbm [shape: f32[2,8,256], index: 1, kind: input, shape index: {}]   ;;  %s324_s2 = inlined_call_operand.hbm [shape: f32[8,128], index: 2, kind: output, shape index: {}]  }
   0x1   :  { %8 = vsyncpa [#allocation6], 0 }
   0x2   :  { %9 = vsyncpa [#allocation4], 0  ;;  %s247_s9 = smov [#allocation2]   ;;  %s172_s13 = scalar_lea.hbm %s322_s0, 256 }
   0x3   :  { %s15_s10 = sshll.u32 %s247_s9, 4  ;;  %p173_p0 = scmp.ne.s32.totalorder %s322_s0, %s172_s13  ;;  %s16_s10 = int_to_ptr.vmem [resolvable:$true] %s15_s10 }
   0x4   :  { %s174_s18 = scalar_lea.hbm %s322_s0, 512  ;;  %p176_p2 = scmp.lt.u32.totalorder %s172_s13, %s322_s0 }
   0x5   :  { %p175_p1 = scmp.lt.u32.totalorder %s174_s18, %s172_s13 }
   0x7   :  { %p177_p3 = por %p176_p2, %p175_p1 }
   0x9   :  { %p178_p4 = pnand %p177_p3, %p173_p0 }
   0xb   :  { %181 = shalt.err (!%p178_p4)
}
   0xc   :  { %s182_s21 = scalar_lea.vmem %s16_s10, 256  ;;  %p187_p6 = scmp.lt.s32.totalorder %s16_s10, %s16_s10 }
   0xd   :  { %p183_p5 = scmp.ne.s32.totalorder %s16_s10, %s182_s21  ;;  %p188_p7 = scmp.lt.s32.totalorder %s182_s21, %s182_s21 }
   0xf   :  { %p189_p8 = por %p188_p7, %p187_p6 }
  0x11   :  { %p190_p9 = pnand %p189_p8, %p183_p5 }
  0x13   :  { %193 = shalt.err (!%p190_p9)
}
  0x14   :  { %s248_s22 = smov 256   ;;  %s249_s23 = smov 128  }
  0x15   :  { %s250_s24 = smov 8   ;;  %s160_s29 = scalar_lea.hbm %s323_s1, 128 }
  0x16   :  { %21 = dma.hbm_to_vmem [thread:$0]  %s322_s0, 256, %s16_s10, [#allocation3], %s248_s22, %s249_s23, %s250_s24  }
  0x17   :  { %s251_s30 = smov [#allocation5]   ;;  %s218_s6 = scalar_lea.hbm %s323_s1, 384 }
  0x18   :  { %s30_s3 = sshll.u32 %s251_s30, 4  ;;  %p195_p10 = scmp.ne.s32.totalorder %s160_s29, %s218_s6  ;;  %s31_s3 = int_to_ptr.vmem [resolvable:$true] %s30_s3 }
  0x19   :  { %s196_s9 = scalar_lea.hbm %s323_s1, 512  ;;  %p197_p11 = scmp.lt.u32.totalorder %s160_s29, %s323_s1 }
  0x1a   :  { %p198_p12 = scmp.lt.u32.totalorder %s196_s9, %s218_s6  ;;  %p200_p0 = scmp.lt.u32.totalorder %s218_s6, %s160_s29 }
  0x1c   :  { %p199_p13 = por %p198_p12, %p197_p11 }
  0x1e   :  { %p201_p1 = por %p200_p0, %p199_p13 }
  0x20   :  { %p202_p2 = pnand %p201_p1, %p195_p10 }
  0x22   :  { %205 = shalt.err (!%p202_p2)
}
  0x23   :  { %s206_s0 = scalar_lea.vmem %s31_s3, 256  ;;  %p211_p4 = scmp.lt.s32.totalorder %s31_s3, %s31_s3 }
  0x24   :  { %p207_p3 = scmp.ne.s32.totalorder %s31_s3, %s206_s0  ;;  %p212_p5 = scmp.lt.s32.totalorder %s206_s0, %s206_s0 }
  0x26   :  { %p213_p6 = por %p212_p5, %p211_p4 }
  0x28   :  { %p214_p7 = pnand %p213_p6, %p207_p3 }
  0x2a   :  { %217 = shalt.err (!%p214_p7)
}
  0x2b   :  { %36 = dma.hbm_to_vmem [thread:$0]  %s160_s29, 256, %s31_s3, [#allocation6], %s248_s22, %s249_s23, %s250_s24  }
  0x2c   :  { %241 = dma.done.wait [#allocation3], 256  }
  0x2d   :  { %242 = vsyncadd [#allocation3], 4294967040 }
  0x2e   :  { %243 = dma.done.wait [#allocation6], 256  }
  0x2f   :  { %244 = vsyncadd [#allocation6], 4294967040  ;;  %v44_v0 = vld [vmem:[#allocation2] sm:$0xff]  ;;  %s252_s1 = smov 126   ;;  %s253_s10 = smov 127   ;;  %v45_v1 = vld [vmem:[#allocation5] sm:$0xff] }
  0x30   :  { %59 = vrot.lane.b32.xlu1 %v44_v0, %s252_s1  ;;  %50 = vrot.lane.b32.xlu0 %v44_v0, %s253_s10  ;;  %s254_s13 = smov 125   ;;  %s255_s14 = smov 124   ;;  %v98_v2 = vld [vmem:[#allocation5 + $0x8] sm:$0xff]  ;;  %v96_v3 = vld [vmem:[#allocation2 + $0x8] sm:$0xff]  ;;  %vm54_vm0 = vcmask 1039360   ;;  %vm63_vm1 = vcmask 1031168  }
  0x31   :  { %s256_s15 = smov 123   ;;  %v46_v8 = vmul.f32 0.0020289666, %v44_v0  ;;  %vm72_vm2 = vcmask 1022976   ;;  %vm81_vm3 = vcmask 1014784   ;;  %vm90_vm4 = vcmask 1006592  }
  0x32   :  { %v99_v29 = vmul.f32 0.009389464, %v96_v3  ;;  %s257_s16 = smov [#allocation7]  }
  0x33   :  { %s150_s17 = sshll.u32 %s257_s16, 4  ;;  %s151_s17 = int_to_ptr.vmem [resolvable:$true] %s150_s17 }
  0x34   :  { %61 = vrot.lane.b32.xlu1 %v45_v1, %s252_s1  ;;  %52 = vrot.lane.b32.xlu0 %v45_v1, %s253_s10  ;;  %s219_s18 = scalar_lea.vmem %s151_s17, 128  ;;  %p224_p9 = scmp.lt.s32.totalorder %s151_s17, %s151_s17 }
  0x35   :  { %p220_p8 = scmp.ne.s32.totalorder %s151_s17, %s219_s18  ;;  %p225_p10 = scmp.lt.s32.totalorder %s219_s18, %s219_s18 }
  0x37   :  { %p226_p11 = por %p225_p10, %p224_p9 }
  0x38   :  { %70 = vrot.lane.b32.xlu1 %v45_v1, %s254_s13  ;;  %68 = vrot.lane.b32.xlu0 %v44_v0, %s254_s13 }
  0x39   :  { %p227_p12 = pnand %p226_p11, %p220_p8 }
  0x3c   :  { %79 = vrot.lane.b32.xlu1 %v45_v1, %s255_s14  ;;  %77 = vrot.lane.b32.xlu0 %v44_v0, %s255_s14 }
  0x40   :  { %88 = vrot.lane.b32.xlu1 %v45_v1, %s256_s15  ;;  %86 = vrot.lane.b32.xlu0 %v44_v0, %s256_s15 }
  0x44   :  { %105 = vrot.lane.b32.xlu1 %v98_v2, %s253_s10  ;;  %103 = vrot.lane.b32.xlu0 %v96_v3, %s253_s10 }
  0x48   :  { %113 = vrot.lane.b32.xlu1 %v98_v2, %s252_s1  ;;  %111 = vrot.lane.b32.xlu0 %v96_v3, %s252_s1 }
  0x4c   :  { %121 = vrot.lane.b32.xlu1 %v98_v2, %s254_s13  ;;  %119 = vrot.lane.b32.xlu0 %v96_v3, %s254_s13 }
  0x50   :  { %129 = vrot.lane.b32.xlu1 %v98_v2, %s255_s14  ;;  %127 = vrot.lane.b32.xlu0 %v96_v3, %s255_s14 }
  0x54   :  { %137 = vrot.lane.b32.xlu1 %v98_v2, %s256_s15  ;;  %135 = vrot.lane.b32.xlu0 %v96_v3, %s256_s15 }
  0xa2   :  { %v60_v4 = vpop.permute.xlu1 %59  ;;  %v51_v5 = vpop.permute.xlu0 %50 }
  0xa6   :  { %v62_v6 = vpop.permute.xlu1 %61  ;;  %v53_v7 = vpop.permute.xlu0 %52 }
  0xa7   :  { %v55_v9 = vsel %vm54_vm0, %v51_v5, %v53_v7  ;;  %v64_v11 = vsel %vm63_vm1, %v60_v4, %v62_v6 }
  0xa8   :  { %v57_v10 = vmul.f32 -0.025543464, %v55_v9  ;;  %v66_v16 = vmul.f32 0.12857261, %v64_v11 }
  0xaa   :  { %v58_v12 = vadd.f32 %v57_v10, %v46_v8  ;;  %v71_v13 = vpop.permute.xlu1 %70  ;;  %v69_v14 = vpop.permute.xlu0 %68 }
  0xab   :  { %v73_v15 = vsel %vm72_vm2, %v69_v14, %v71_v13 }
  0xac   :  { %v67_v17 = vadd.f32 %v66_v16, %v58_v12  ;;  %v75_v18 = vmul.f32 0.4432098, %v73_v15 }
  0xae   :  { %v80_v19 = vpop.permute.xlu1 %79  ;;  %v78_v20 = vpop.permute.xlu0 %77  ;;  %v76_v23 = vadd.f32 %v75_v18, %v67_v17 }
  0xaf   :  { %v82_v21 = vsel %vm81_vm3, %v78_v20, %v80_v19 }
  0xb0   :  { %v84_v22 = vmul.f32 -0.057657376, %v82_v21 }
  0xb2   :  { %v89_v24 = vpop.permute.xlu1 %88  ;;  %v87_v25 = vpop.permute.xlu0 %86  ;;  %v85_v27 = vadd.f32 %v84_v22, %v76_v23 }
  0xb3   :  { %v91_v26 = vsel %vm90_vm4, %v87_v25, %v89_v24 }
  0xb4   :  { %v93_v28 = vmul.f32 0.009389464, %v91_v26 }
  0xb6   :  { %v94_v30 = vadd.f32 %v93_v28, %v85_v27  ;;  %v106_v31 = vpop.permute.xlu1 %105  ;;  %v104_v32 = vpop.permute.xlu0 %103 }
  0xb7   :  { %v107_v36 = vsel %vm54_vm0, %v104_v32, %v106_v31 }
  0xb8   :  { %v100_v33 = vadd.f32 %v99_v29, %v94_v30  ;;  %v109_v38 = vmul.f32 -0.057657376, %v107_v36 }
  0xba   :  { %v114_v34 = vpop.permute.xlu1 %113  ;;  %v112_v35 = vpop.permute.xlu0 %111  ;;  %v110_v43 = vadd.f32 %v109_v38, %v100_v33 }
  0xbb   :  { %v115_v37 = vsel %vm63_vm1, %v112_v35, %v114_v34 }
  0xbc   :  { %v117_v42 = vmul.f32 0.4432098, %v115_v37 }
  0xbe   :  { %v122_v39 = vpop.permute.xlu1 %121  ;;  %v120_v40 = vpop.permute.xlu0 %119  ;;  %v118_v48 = vadd.f32 %v117_v42, %v110_v43 }
  0xbf   :  { %v123_v41 = vsel %vm72_vm2, %v120_v40, %v122_v39 }
  0xc0   :  { %v125_v44 = vmul.f32 0.12857261, %v123_v41 }
  0xc2   :  { %v130_v45 = vpop.permute.xlu1 %129  ;;  %v128_v46 = vpop.permute.xlu0 %127  ;;  %v126_v50 = vadd.f32 %v125_v44, %v118_v48 }
  0xc3   :  { %v131_v47 = vsel %vm81_vm3, %v128_v46, %v130_v45 }
  0xc4   :  { %v133_v49 = vmul.f32 -0.025543464, %v131_v47 }
  0xc6   :  { %v138_v51 = vpop.permute.xlu1 %137  ;;  %v136_v52 = vpop.permute.xlu0 %135  ;;  %v134_v54 = vadd.f32 %v133_v49, %v126_v50 }
  0xc7   :  { %v139_v53 = vsel %vm90_vm4, %v136_v52, %v138_v51 }
  0xc8   :  { %v141_v55 = vmul.f32 0.0020289666, %v139_v53 }
  0xca   :  { %v142_v56 = vadd.f32 %v141_v55, %v134_v54 }
  0xcc   :  { %143 = vst [vmem:[#allocation7] sm:$0xff] %v142_v56 }
  0xcd   :  { %230 = shalt.err (!%p227_p12)
}
  0xce   :  { %s231_s21 = scalar_lea.hbm %s324_s2, 128 }
  0xcf   :  { %p232_p13 = scmp.ne.s32.totalorder %s324_s2, %s231_s21  ;;  %p235_p0 = scmp.lt.u32.totalorder %s231_s21, %s324_s2 }
  0xd1   :  { %p237_p1 = pnand %p235_p0, %p232_p13 }
  0xd3   :  { %240 = shalt.err (!%p237_p1)
}
  0xd4   :  { %153 = dma.vmem_to_hbm [thread:$0]  %s151_s17, 128, %s324_s2, [#allocation4]  }
  0xd5   :  { %245 = dma.done.wait [#allocation4], 128  }
  0xd6   :  { %246 = vsyncadd [#allocation4], 4294967168 }
  0xd7   :  { %157 = vsyncpa [#allocation3], 1 }
  0xd8   :  { %158 = vsyncpa [#allocation6], 1 }
  0xd9   :  { %159 = vsyncpa [#allocation4], 1 }

</bundles_post_ra>
